<compile_context>
chip_gen: v7x
topology: tpu7x:2x2x1
jax: 0.10.0
libtpu: 0.0.40
codegen_flags: <defaults>
</compile_context>

<pallas_src>
import jax
import jax.numpy as jnp
from jax.experimental import pallas as pl
from jax.experimental.pallas import tpu as pltpu

BN_EPS = 1e-5


def layer_kernel(x_ref, w_ref, gamma_ref, beta_ref, o_ref):
    # Single full-array VMEM blocks (no grid): x (B, Fi), w (Fi, Fo),
    # gamma/beta (1, Fo), out (B, Fo).
    x = x_ref[...]
    w = w_ref[...]

    # bf16 MXU operands, f32 accumulation (native MXU path on all chips).
    h = jnp.dot(x.astype(jnp.bfloat16), w.astype(jnp.bfloat16),
                preferred_element_type=jnp.float32)          # (B, Fo) f32

    # sigmoid(h) = 0.5 * (tanh(h/2) + 1): one EUP transcendental, f32 path.
    s = 0.5 * (jnp.tanh(0.5 * h) + 1.0)

    # BatchNorm1d (training mode): per-feature biased variance over the batch.
    # One-pass statistics is safe here because sigmoid outputs lie in (0, 1).
    inv_n = 1.0 / s.shape[0]
    sum_s = jnp.sum(s, axis=0, keepdims=True)                 # (1, Fo)
    sum_s2 = jnp.sum(s * s, axis=0, keepdims=True)            # (1, Fo)
    mean = sum_s * inv_n
    var = jnp.maximum(sum_s2 * inv_n - mean * mean, 0.0)

    # Fold gamma into the per-feature scale and mean into the shift so the
    # (B, Fo) elementwise tail is one multiply + one add.
    scale = jax.lax.rsqrt(var + BN_EPS) * gamma_ref[...]      # (1, Fo)
    shift = beta_ref[...] - mean * scale                      # (1, Fo)

    o_ref[...] = (s * scale + shift).astype(o_ref.dtype)


def layer_forward(x, w, gamma, beta):
    B = x.shape[0]
    F_out = w.shape[1]
    return pl.pallas_call(
        layer_kernel,
        out_shape=jax.ShapeDtypeStruct((B, F_out), jnp.float32),
        in_specs=[pl.BlockSpec(memory_space=pltpu.MemorySpace.VMEM)] * 4,
        out_specs=pl.BlockSpec(memory_space=pltpu.MemorySpace.VMEM),
    )(x, w, gamma, beta)


if __name__ == "__main__":
    BATCH = 8
    HIDDEN = 32          # in_features == out_features (required by the module)

    key = jax.random.PRNGKey(0)
    k_x, k_w = jax.random.split(key)

    # torch.randn-style standard-normal weight init; BatchNorm1d defaults.
    w = jax.random.normal(k_w, (HIDDEN, HIDDEN), dtype=jnp.float32)
    gamma = jnp.ones((1, HIDDEN), dtype=jnp.float32)
    beta = jnp.zeros((1, HIDDEN), dtype=jnp.float32)

    x = jax.random.normal(k_x, (BATCH, HIDDEN), dtype=jnp.float32)

    out = jax.jit(layer_forward)(x, w, gamma, beta)
    jax.block_until_ready(out)

    # Reference 1: same math as the kernel (bf16 matmul operands, f32 acc,
    # tanh-form sigmoid, one-pass variance) -> tight tolerance.
    h_k = jnp.dot(x.astype(jnp.bfloat16), w.astype(jnp.bfloat16),
                  preferred_element_type=jnp.float32)
    s_k = 0.5 * (jnp.tanh(0.5 * h_k) + 1.0)
    m_k = s_k.mean(axis=0, keepdims=True)
    v_k = jnp.maximum((s_k * s_k).mean(axis=0, keepdims=True) - m_k * m_k, 0.0)
    ref_k = (s_k - m_k) * jax.lax.rsqrt(v_k + BN_EPS) * gamma + beta
    assert jnp.allclose(out, ref_k, atol=1e-3, rtol=1e-3), "mismatch vs kernel-math ref"

    # Reference 2: pure-f32 PyTorch training-mode semantics (exp sigmoid,
    # two-pass biased variance) -> loose tolerance for the bf16 MXU operands.
    h_ref = jax.nn.sigmoid(x @ w)
    mean = h_ref.mean(axis=0, keepdims=True)
    var = ((h_ref - mean) ** 2).mean(axis=0, keepdims=True)
    ref = (h_ref - mean) / jnp.sqrt(var + BN_EPS) * gamma + beta
    assert jnp.allclose(out, ref, atol=5e-2, rtol=5e-2), "mismatch vs f32 reference"

    print("KERNEL_OK")
</pallas_src>

<mosaic_0001>
module attributes {stable_mosaic.version = 11 : i64} {
  func.func @layer_kernel(%arg0: memref<8x32xf32, #tpu.memory_space<vmem>>, %arg1: memref<32x32xf32, #tpu.memory_space<vmem>>, %arg2: memref<1x32xf32, #tpu.memory_space<vmem>>, %arg3: memref<1x32xf32, #tpu.memory_space<vmem>>, %arg4: memref<8x32xf32, #tpu.memory_space<vmem>>) attributes {dimension_semantics = [], scalar_prefetch = 0 : i64, scratch_operands = 0 : i64, tpu.core_type = #tpu.core_type<tc>} {
    %c0 = arith.constant 0 : index
    %c0_0 = arith.constant 0 : index
    %0 = vector.load %arg0[%c0, %c0_0] : memref<8x32xf32, #tpu.memory_space<vmem>>, vector<8x32xf32>
    %c0_1 = arith.constant 0 : index
    %c0_2 = arith.constant 0 : index
    %1 = vector.load %arg1[%c0_1, %c0_2] : memref<32x32xf32, #tpu.memory_space<vmem>>, vector<32x32xf32>
    %2 = arith.truncf %0 : vector<8x32xf32> to vector<8x32xbf16>
    %3 = arith.truncf %1 : vector<32x32xf32> to vector<32x32xbf16>
    %cst = arith.constant dense<0.000000e+00> : vector<8x32xf32>
    %4 = tpu.matmul %2, %3, %cst {dimension_numbers = #tpu.dot_dimension_numbers<[1], [0], [0], [1], [0, 0, 1, 1], [], []>} : vector<8x32xbf16>, vector<32x32xbf16>, vector<8x32xf32> -> vector<8x32xf32>
    %cst_3 = arith.constant 5.000000e-01 : f32
    %5 = vector.broadcast %cst_3 : f32 to vector<8x32xf32>
    %6 = arith.mulf %5, %4 : vector<8x32xf32>
    %7 = math.tanh %6 : vector<8x32xf32>
    %cst_4 = arith.constant 1.000000e+00 : f32
    %8 = vector.broadcast %cst_4 : f32 to vector<8x32xf32>
    %9 = arith.addf %7, %8 : vector<8x32xf32>
    %cst_5 = arith.constant 5.000000e-01 : f32
    %10 = vector.broadcast %cst_5 : f32 to vector<8x32xf32>
    %11 = arith.mulf %10, %9 : vector<8x32xf32>
    %cst_6 = arith.constant dense<0.000000e+00> : vector<32xf32>
    %12 = vector.multi_reduction <add>, %11, %cst_6 [0] : vector<8x32xf32> to vector<32xf32>
    %13 = vector.shape_cast %12 : vector<32xf32> to vector<1x32xf32>
    %14 = arith.mulf %11, %11 : vector<8x32xf32>
    %cst_7 = arith.constant dense<0.000000e+00> : vector<32xf32>
    %15 = vector.multi_reduction <add>, %14, %cst_7 [0] : vector<8x32xf32> to vector<32xf32>
    %16 = vector.shape_cast %15 : vector<32xf32> to vector<1x32xf32>
    %cst_8 = arith.constant 1.250000e-01 : f32
    %17 = vector.broadcast %cst_8 : f32 to vector<1x32xf32>
    %18 = arith.mulf %13, %17 : vector<1x32xf32>
    %cst_9 = arith.constant 1.250000e-01 : f32
    %19 = vector.broadcast %cst_9 : f32 to vector<1x32xf32>
    %20 = arith.mulf %16, %19 : vector<1x32xf32>
    %21 = arith.mulf %18, %18 : vector<1x32xf32>
    %22 = arith.subf %20, %21 : vector<1x32xf32>
    %cst_10 = arith.constant 0.000000e+00 : f32
    %23 = vector.broadcast %cst_10 : f32 to vector<1x32xf32>
    %24 = arith.maximumf %22, %23 : vector<1x32xf32>
    %cst_11 = arith.constant 9.99999974E-6 : f32
    %25 = vector.broadcast %cst_11 : f32 to vector<1x32xf32>
    %26 = arith.addf %24, %25 : vector<1x32xf32>
    %27 = math.rsqrt %26 : vector<1x32xf32>
    %c0_12 = arith.constant 0 : index
    %c0_13 = arith.constant 0 : index
    %28 = vector.load %arg2[%c0_12, %c0_13] : memref<1x32xf32, #tpu.memory_space<vmem>>, vector<1x32xf32>
    %29 = arith.mulf %27, %28 : vector<1x32xf32>
    %c0_14 = arith.constant 0 : index
    %c0_15 = arith.constant 0 : index
    %30 = vector.load %arg3[%c0_14, %c0_15] : memref<1x32xf32, #tpu.memory_space<vmem>>, vector<1x32xf32>
    %31 = arith.mulf %18, %29 : vector<1x32xf32>
    %32 = arith.subf %30, %31 : vector<1x32xf32>
    %33 = vector.broadcast %29 : vector<1x32xf32> to vector<8x32xf32>
    %34 = arith.mulf %11, %33 : vector<8x32xf32>
    %35 = vector.broadcast %32 : vector<1x32xf32> to vector<8x32xf32>
    %36 = arith.addf %34, %35 : vector<8x32xf32>
    %c0_16 = arith.constant 0 : index
    %c0_17 = arith.constant 0 : index
    %37 = vector.load %arg4[%c0_16, %c0_17] : memref<8x32xf32, #tpu.memory_space<vmem>>, vector<8x32xf32>
    tpu.vector_store %arg4[%c0_16, %c0_17], %36 {strides = array<i32>} : memref<8x32xf32, #tpu.memory_space<vmem>>, vector<8x32xf32>,
    return
  }
}

</mosaic_0001>

<bundles_post_ra>
// kernel: layer_forward.1
= control target key start
LH: loop header
LB: loop body
LE: loop exit
PB: predicated region body
PF: predicated region fallthrough
CT: control target
= control target key end

     0   :  { %9 = vsyncpa [#allocation3], 0  ;;  %s337_s0 = inlined_call_operand.hbm [shape: f32[8,32], index: 0, kind: input, shape index: {}]   ;;  %s338_s1 = inlined_call_operand.hbm [shape: f32[32,32], index: 1, kind: input, shape index: {}]   ;;  %s339_s2 = inlined_call_operand.vmem [shape: f32[1,32], index: 2, kind: input, shape index: {}]   ;;  %s340_s3 = inlined_call_operand.vmem [shape: f32[1,32], index: 3, kind: input, shape index: {}]   ;;  %s341_s4 = inlined_call_operand.hbm [shape: f32[8,32], index: 4, kind: output, shape index: {}]  }
   0x1   :  { %10 = vsyncpa [#allocation6], 0 }
   0x2   :  { %11 = vsyncpa [#allocation4], 0  ;;  %s252_s15 = smov [#allocation2]   ;;  %s253_s17 = smov [#allocation5]  }
   0x3   :  { %s18_s16 = sshll.u32 %s252_s15, 4  ;;  %s27_s18 = sshll.u32 %s253_s17, 4  ;;  %s19_s16 = int_to_ptr.vmem [resolvable:$true] %s18_s16  ;;  %s284_s18 = int_to_ptr.vmem [resolvable:$true] %s27_s18 }
   0x4   :  { %s180_s21 = scalar_lea.hbm %s337_s0, 128 }
   0x5   :  { %p181_p0 = scmp.ne.s32.totalorder %s337_s0, %s180_s21  ;;  %p184_p1 = scmp.lt.u32.totalorder %s180_s21, %s337_s0 }
   0x7   :  { %p186_p2 = pnand %p184_p1, %p181_p0 }
   0x9   :  { %189 = shalt.err (!%p186_p2)
}
   0xa   :  { %s190_s26 = scalar_lea.vmem %s19_s16, 128  ;;  %p195_p4 = scmp.lt.s32.totalorder %s19_s16, %s19_s16 }
   0xb   :  { %p191_p3 = scmp.ne.s32.totalorder %s19_s16, %s190_s26  ;;  %p196_p5 = scmp.lt.s32.totalorder %s190_s26, %s190_s26 }
   0xd   :  { %p197_p6 = por %p196_p5, %p195_p4 }
   0xf   :  { %p198_p7 = pnand %p197_p6, %p191_p3 }
  0x11   :  { %201 = shalt.err (!%p198_p7)
}
  0x12   :  { %21 = dma.hbm_to_vmem [thread:$0]  %s337_s0, 128, %s19_s16, [#allocation3]  }
  0x13   :  { %s202_s5 = scalar_lea.hbm %s338_s1, 512 }
  0x14   :  { %p203_p8 = scmp.ne.s32.totalorder %s338_s1, %s202_s5  ;;  %p206_p9 = scmp.lt.u32.totalorder %s202_s5, %s338_s1 }
  0x16   :  { %p208_p10 = pnand %p206_p9, %p203_p8 }
  0x18   :  { %211 = shalt.err (!%p208_p10)
}
  0x19   :  { %s212_s10 = scalar_lea.vmem %s284_s18, 512  ;;  %p217_p12 = scmp.lt.s32.totalorder %s284_s18, %s284_s18 }
  0x1a   :  { %p213_p11 = scmp.ne.s32.totalorder %s284_s18, %s212_s10  ;;  %p218_p13 = scmp.lt.s32.totalorder %s212_s10, %s212_s10 }
  0x1c   :  { %p219_p0 = por %p218_p13, %p217_p12 }
  0x1e   :  { %p220_p1 = pnand %p219_p0, %p213_p11 }
  0x20   :  { %223 = shalt.err (!%p220_p1)
}
  0x21   :  { %s254_s0 = smov 128   ;;  %s255_s11 = smov 8  }
  0x22   :  { %33 = dma.hbm_to_vmem [thread:$0]  %s338_s1, 512, %s284_s18, [#allocation6], %s254_s0, %s254_s0, %s255_s11  }
  0x23   :  { %246 = dma.done.wait [#allocation3], 128  }
  0x24   :  { %247 = vsyncadd [#allocation3], 4294967168 }
  0x25   :  { %248 = dma.done.wait [#allocation6], 512  }
  0x26   :  { %249 = vsyncadd [#allocation6], 4294966784  ;;  %v256_v0 = vmov 0.0   ;;  %vm257_vm0 = vmmov 0   ;;  %v46_v1 = vld [vmem:[#allocation5] sm:$0xff]  ;;  %v47_v2 = vld [vmem:[#allocation5 + $0x8] sm:$0xff]  ;;  %v128_v38 = vlaneseq }
  0x27   :  { %161 = vmatprep.subr.bf16.mxu0 %v256_v0  ;;  %165 = vmatprep.mubr.msk.bf16.mxu0 %vm257_vm0, %v256_v0  ;;  %v48_v3 = vld [vmem:[#allocation5 + $0x10] sm:$0xff]  ;;  %v51_v4 = vpack.c.bf16 %v47_v2, %v46_v1  ;;  %v49_v5 = vld [vmem:[#allocation5 + $0x18] sm:$0xff]  ;;  %vm53_vm1 = vcmask 261120   ;;  %s258_s17 = smov [#allocation7]  }
  0x28   :  { %v52_v6 = vpack.c.bf16 %v49_v5, %v48_v3  ;;  %v45_v7 = vld [vmem:[#allocation2] sm:$0xff]  ;;  %v129_v39 = vshrl.u32 %v128_v38, 7  ;;  %s147_s18 = sshll.u32 %s258_s17, 4  ;;  %s148_s18 = int_to_ptr.vmem [resolvable:$true] %s147_s18 }
  0x29   :  { %162 = vmatpush3.bf16.msra.mxu0 %v51_v4  ;;  %v50_v8 = vpack.c.bf16 %v45_v7, %v45_v7  ;;  %v123_v40 = vld [vmem:[%s339_s2] sm:$0x1]  ;;  %s224_s19 = scalar_lea.vmem %s148_s18, 128  ;;  %p229_p3 = scmp.lt.s32.totalorder %s148_s18, %s148_s18 }
  0x2a   :  { %163 = vmatprep.subr.bf16.mxu0 %v256_v0  ;;  %v130_v41 = vsub.s32 0, %v129_v39  ;;  %v125_v44 = vld [vmem:[%s340_s3] sm:$0x1]  ;;  %p225_p2 = scmp.ne.s32.totalorder %s148_s18, %s224_s19  ;;  %p230_p4 = scmp.lt.s32.totalorder %s224_s19, %s224_s19 }
  0x2c   :  { %p231_p5 = por %p230_p4, %p229_p3 }
  0x2d   :  { %164 = vmatpush3.bf16.msra.mxu0 %v52_v6 }
  0x2e   :  { %p232_p6 = pnand %p231_p5, %p225_p2 }
  0x30   :  { %166 = vmatmul.mubr.msk.bf16.vlgmr.msra.gmra.mrb[0].mxu0 %vm53_vm1, %v50_v8 }
 0x103   :  { %v91_v9 = vpop.f32.mrb[0].mxu0 }
 0x104   :  { %v97_v10 = vmul.f32 0.5, %v91_v9  ;;  %v167_v11 = vpop.f32.mrb[1].mxu0 }
 0x105   :  { %v94_v12 = vpop.f32.mrb[2].mxu0 }
 0x106   :  { %176 = vtanh.f32 %v97_v10  ;;  %v168_v13 = vpop.f32.mrb[3].mxu0 }
 0x110   :  { %v177_v14 = vpop.eup %176 }
 0x111   :  { %v99_v15 = vadd.f32 1.0, %v177_v14 }
 0x113   :  { %v100_v16 = vmul.f32 0.5, %v99_v15 }
 0x115   :  { %v101_v17 = vsel %vm53_vm1, %v100_v16, 0.0  ;;  %v108_v18 = vmul.f32 %v100_v16, %v100_v16 }
 0x116   :  { %v102_v19 = vrot.slane %v101_v17, 4 }
 0x117   :  { %v109_v20 = vsel %vm53_vm1, %v108_v18, 0.0 }
 0x118   :  { %v103_v21 = vadd.f32 %v102_v19, %v101_v17  ;;  %v110_v22 = vrot.slane %v109_v20, 4 }
 0x11a   :  { %v104_v23 = vrot.slane %v103_v21, 2  ;;  %v111_v24 = vadd.f32 %v110_v22, %v109_v20 }
 0x11c   :  { %v105_v25 = vadd.f32 %v104_v23, %v103_v21  ;;  %v112_v26 = vrot.slane %v111_v24, 2 }
 0x11e   :  { %v106_v27 = vrot.slane %v105_v25, 1  ;;  %v113_v28 = vadd.f32 %v112_v26, %v111_v24 }
 0x120   :  { %v107_v29 = vadd.f32 %v106_v27, %v105_v25  ;;  %v114_v30 = vrot.slane %v113_v28, 1 }
 0x122   :  { %v115_v31 = vadd.f32 %v114_v30, %v113_v28  ;;  %v116_v32 = vmul.f32 0.125, %v107_v29 }
 0x124   :  { %v117_v33 = vmul.f32 0.125, %v115_v31  ;;  %v118_v34 = vmul.f32 %v116_v32, %v116_v32 }
 0x126   :  { %v119_v35 = vsub.f32 %v117_v33, %v118_v34 }
 0x128   :  { %v120_v36 = vmax.f32 %v119_v35, 0.0 }
 0x12a   :  { %v121_v37 = vadd.f32 1e-05, %v120_v36 }
 0x12c   :  { %178 = vrsqrt.f32 %v121_v37 }
 0x136   :  { %v179_v42 = vpop.eup %178 }
 0x137   :  { %v124_v43 = vmul.f32 %v179_v42, %v123_v40 }
 0x139   :  { %v126_v45 = vmul.f32 %v124_v43, %v116_v32  ;;  %v131_v46 = vrot.slane %v124_v43, %v130_v41 }
 0x13b   :  { %v127_v47 = vsub.f32 %v125_v44, %v126_v45  ;;  %v132_v48 = vmul.f32 %v131_v46, %v100_v16 }
 0x13d   :  { %v137_v49 = vrot.slane %v127_v47, %v130_v41 }
 0x13f   :  { %v139_v50 = vadd.f32 %v137_v49, %v132_v48 }
 0x141   :  { %140 = vst.msk [vmem:[#allocation7] sm:$0xff] %vm53_vm1, %v139_v50 }
 0x142   :  { %235 = shalt.err (!%p232_p6)
}
 0x143   :  { %s236_s20 = scalar_lea.hbm %s341_s4, 128 }
 0x144   :  { %p237_p7 = scmp.ne.s32.totalorder %s341_s4, %s236_s20  ;;  %p240_p8 = scmp.lt.u32.totalorder %s236_s20, %s341_s4 }
 0x146   :  { %p242_p9 = pnand %p240_p8, %p237_p7 }
 0x148   :  { %245 = shalt.err (!%p242_p9)
}
 0x149   :  { %150 = dma.vmem_to_hbm [thread:$0]  %s148_s18, 128, %s341_s4, [#allocation4]  }
 0x14a   :  { %250 = dma.done.wait [#allocation4], 128  }
 0x14b   :  { %251 = vsyncadd [#allocation4], 4294967168 }
 0x14c   :  { %154 = vsyncpa [#allocation3], 1 }
 0x14d   :  { %155 = vsyncpa [#allocation6], 1 }
 0x14e   :  { %156 = vsyncpa [#allocation4], 1 }

</bundles_post_ra>
